<compile_context>
chip_gen: v7x
topology: tpu7x:2x2x1
jax: 0.10.0
libtpu: 0.0.40
codegen_flags: <defaults>
</compile_context>

<pallas_src>
import functools

import jax
import jax.numpy as jnp
from jax.experimental import pallas as pl
from jax.experimental.pallas import tpu as pltpu


# --------------------------------------------------------------------------
# Fused multi-head attention pooling kernel
# --------------------------------------------------------------------------
def _mha_pool_kernel(batch_ref, x_ref, w_ref, b_ref, out_ref, *,
                     num_graphs, num_heads):
    n_pad, hidden = x_ref.shape          # padded node count, per-node feature dim
    g = num_graphs
    nh = num_heads

    x = x_ref[...]                       # (N, H)  f32
    batch = batch_ref[...]               # (1, N)  int32
    valid = batch < g                    # (1, N)  bool; padded / OOR nodes excluded

    # ---- graph-membership one-hot, built ONCE and reused everywhere ----------
    g_iota = jax.lax.broadcasted_iota(jnp.int32, (g, n_pad), 0)
    memf_b = g_iota == batch                               # (G, N) bool
    memf = memf_b.astype(jnp.float32)                      # (G, N) exact 0/1

    # ---- 1) all-head attention scores: one MXU matmul -------------------------
    # scores[h, n] = x[n] . W[h] + b[h]
    scores = jax.lax.dot_general(
        w_ref[...], x, (((1,), (1,)), ((), ())),
        preferred_element_type=jnp.float32) + b_ref[...]   # (nh, N)

    # ---- 2) per-(graph, head) max, gathered back per node ---------------------
    # The masked segment max is the only step needing (G, N) work; done one
    # head at a time so the peak temporary is (G, N), never (G*nh, N).
    row_iota = jax.lax.broadcasted_iota(jnp.int32, (nh, n_pad), 0)
    m_node = jnp.zeros((nh, n_pad), jnp.float32)
    for h in range(nh):                                    # nh: small static const
        s_h = scores[h:h + 1, :]                           # (1, N)
        masked = jnp.where(memf_b, s_h, jnp.float32(-1e30))        # (G, N)
        m_g = jnp.max(masked, axis=1, keepdims=True)                # (G, 1)
        m_n = jnp.sum(m_g * memf, axis=0, keepdims=True)            # (1, N) gather
        m_node = jnp.where(row_iota == h, m_n, m_node)              # place row h

    # ---- 3) segment softmax, head-vectorized at (nh, N) ------------------------
    shifted = jnp.minimum(scores - m_node, 0.0)            # clamp guards padded nodes
    e = jnp.where(valid, jnp.exp(shifted), 0.0)            # (nh, N)
    seg_sum = jax.lax.dot_general(                         # (nh, G): K=N on the MXU
        e, memf, (((1,), (1,)), ((), ())),
        preferred_element_type=jnp.float32)
    denom = jax.lax.dot_general(                           # gather back per node (nh, N)
        seg_sum, memf, (((1,), (0,)), ((), ())),
        preferred_element_type=jnp.float32)
    alpha = e / (denom + 1e-9)                             # (nh, N); 0 on padded nodes

    # ---- 4) pooled graph embeddings, written lane-dense ------------------------
    # out[g, h*H:(h+1)*H] = sum_n memf[g, n] * alpha[h, n] * x[n, :]
    for h in range(nh):
        w_gn = memf * alpha[h:h + 1, :]                    # (G, N)
        pooled_h = jnp.dot(w_gn, x,
                           preferred_element_type=jnp.float32)      # (G, H)
        out_ref[:, h * hidden:(h + 1) * hidden] = pooled_h


def multihead_attention_pool(node_embeds, batch, W, b, num_graphs):
    """node_embeds: (N, H) f32, batch: (N,) int32, W: (num_heads, H), b: (num_heads,)."""
    num_graphs = int(num_graphs)
    n_nodes, hidden = node_embeds.shape
    num_heads = W.shape[0]
    out_w = num_heads * hidden

    # Lane-align the node axis (lane dim of every (·, N) intermediate and K dim
    # of the pooled matmuls).  Padded nodes get an out-of-range batch id so they
    # never contribute to max / sum / pooling.
    n_pad = int(pl.cdiv(n_nodes, 128)) * 128
    pad = n_pad - n_nodes
    x = jnp.pad(node_embeds.astype(jnp.float32), ((0, pad), (0, 0)))
    batch_p = jnp.pad(batch.astype(jnp.int32), (0, pad),
                      constant_values=num_graphs).reshape(1, -1)

    # Advisory cost estimate + explicit VMEM budget (with headroom).
    flops = 2 * num_heads * n_pad * (hidden + 2 * num_graphs
                                     + num_graphs * hidden)
    bytes_accessed = 4 * (n_pad * hidden + n_pad + num_heads * (hidden + 1)
                          + num_graphs * out_w)
    vmem_est = 4 * (n_pad * hidden + 3 * num_graphs * n_pad
                    + 6 * num_heads * n_pad + num_graphs * out_w) * 2
    vmem_limit = int(min(max(vmem_est, 32 * 1024 * 1024), 96 * 1024 * 1024))

    kernel = functools.partial(_mha_pool_kernel, num_graphs=num_graphs,
                               num_heads=num_heads)
    return pl.pallas_call(
        kernel,
        out_shape=jax.ShapeDtypeStruct((num_graphs, out_w), jnp.float32),
        in_specs=[pl.BlockSpec(memory_space=pltpu.MemorySpace.VMEM)] * 4,
        out_specs=pl.BlockSpec(memory_space=pltpu.MemorySpace.VMEM),
        compiler_params=pltpu.CompilerParams(vmem_limit_bytes=vmem_limit),
        cost_estimate=pl.CostEstimate(flops=flops,
                                      transcendentals=num_heads * n_pad,
                                      bytes_accessed=bytes_accessed),
    )(batch_p, x, W.astype(jnp.float32), b.astype(jnp.float32).reshape(-1, 1))


# --------------------------------------------------------------------------
# Plain-JAX reference (mirrors the torch module)
# --------------------------------------------------------------------------
def _ref_pool(node_embeds, batch, W, b, num_graphs):
    hp = jax.lax.Precision.HIGHEST
    outs = []
    for h in range(W.shape[0]):
        s = jnp.dot(node_embeds, W[h], precision=hp) + b[h]
        s = s - jax.ops.segment_max(s, batch, num_segments=num_graphs)[batch]
        e = jnp.exp(s)
        denom = jax.ops.segment_sum(e, batch, num_segments=num_graphs)[batch] + 1e-9
        alpha = e / denom
        outs.append(jax.ops.segment_sum(node_embeds * alpha[:, None], batch,
                                        num_segments=num_graphs))
    return jnp.concatenate(outs, axis=-1)


# --------------------------------------------------------------------------
# Demo / correctness check
# --------------------------------------------------------------------------
if __name__ == "__main__":
    key = jax.random.PRNGKey(0)
    k1, k2, k3 = jax.random.split(key, 3)

    HIDDEN = 32
    NUM_HEADS = 4        # pooled output width = 4 * 32 = 128 (lane-dense)
    N_NODES = 14         # not a multiple of 128 -> exercises padding
    NUM_GRAPHS = 2

    node_embeds = jax.random.normal(k1, (N_NODES, HIDDEN), jnp.float32)
    batch = jnp.array([0] * 9 + [1] * 5, jnp.int32)
    W = jax.random.normal(k2, (NUM_HEADS, HIDDEN), jnp.float32) * 0.1
    b = jax.random.normal(k3, (NUM_HEADS,), jnp.float32) * 0.1

    out = multihead_attention_pool(node_embeds, batch, W, b, NUM_GRAPHS)
    jax.block_until_ready(out)

    ref = _ref_pool(node_embeds, batch, W, b, NUM_GRAPHS)
    assert out.shape == (NUM_GRAPHS, NUM_HEADS * HIDDEN), out.shape
    max_err = float(jnp.max(jnp.abs(out - ref)))
    # Tolerance covers multi-pass-f32 MXU rounding vs. the HIGHEST-precision
    # reference (per the review's correctness note); algorithmic errors are O(1).
    assert jnp.allclose(out, ref, rtol=2e-3, atol=2e-3), f"max abs err {max_err}"

    print("KERNEL_OK")
</pallas_src>

<mosaic_0001>
module attributes {stable_mosaic.version = 11 : i64} {
  func.func @_mha_pool_kernel(%arg0: memref<1x128xi32, #tpu.memory_space<vmem>>, %arg1: memref<128x32xf32, #tpu.memory_space<vmem>>, %arg2: memref<4x32xf32, #tpu.memory_space<vmem>>, %arg3: memref<4x1xf32, #tpu.memory_space<vmem>>, %arg4: memref<2x128xf32, #tpu.memory_space<vmem>>) attributes {dimension_semantics = [], scalar_prefetch = 0 : i64, scratch_operands = 0 : i64, tpu.core_type = #tpu.core_type<tc>} {
    %c0 = arith.constant 0 : index
    %c0_0 = arith.constant 0 : index
    %0 = vector.load %arg1[%c0, %c0_0] : memref<128x32xf32, #tpu.memory_space<vmem>>, vector<128x32xf32>
    %c0_1 = arith.constant 0 : index
    %c0_2 = arith.constant 0 : index
    %1 = vector.load %arg0[%c0_1, %c0_2] : memref<1x128xi32, #tpu.memory_space<vmem>>, vector<1x128xi32>
    %c2_i32 = arith.constant 2 : i32
    %2 = vector.broadcast %c2_i32 : i32 to vector<1x128xi32>
    %3 = arith.cmpi slt, %1, %2 : vector<1x128xi32>
    %4 = tpu.iota {dimensions = array<i32: 0>} : vector<2x128xi32>
    %5 = vector.broadcast %1 : vector<1x128xi32> to vector<2x128xi32>
    %6 = arith.cmpi eq, %4, %5 : vector<2x128xi32>
    %7 = arith.extui %6 : vector<2x128xi1> to vector<2x128xi32>
    %8 = arith.sitofp %7 : vector<2x128xi32> to vector<2x128xf32>
    %c0_3 = arith.constant 0 : index
    %c0_4 = arith.constant 0 : index
    %9 = vector.load %arg2[%c0_3, %c0_4] : memref<4x32xf32, #tpu.memory_space<vmem>>, vector<4x32xf32>
    %cst = arith.constant dense<0.000000e+00> : vector<4x128xf32>
    %10 = tpu.matmul %9, %0, %cst {dimension_numbers = #tpu.dot_dimension_numbers<[1], [1], [0], [0], [0, 0, 1, 0], [], []>} : vector<4x32xf32>, vector<128x32xf32>, vector<4x128xf32> -> vector<4x128xf32>
    %c0_5 = arith.constant 0 : index
    %c0_6 = arith.constant 0 : index
    %11 = vector.load %arg3[%c0_5, %c0_6] : memref<4x1xf32, #tpu.memory_space<vmem>>, vector<4x1xf32>
    %12 = vector.broadcast %11 : vector<4x1xf32> to vector<4x128xf32>
    %13 = arith.addf %10, %12 : vector<4x128xf32>
    %14 = tpu.iota {dimensions = array<i32: 0>} : vector<4x128xi32>
    %cst_7 = arith.constant 0.000000e+00 : f32
    %15 = vector.broadcast %cst_7 : f32 to vector<4x128xf32>
    %16 = vector.extract_strided_slice %13 {offsets = [0, 0], sizes = [1, 128], strides = [1, 1]} : vector<4x128xf32> to vector<1x128xf32>
    %cst_8 = arith.constant -1.000000e+30 : f32
    %17 = vector.shape_cast %16 : vector<1x128xf32> to vector<1x128xf32>
    %18 = vector.broadcast %17 : vector<1x128xf32> to vector<2x128xf32>
    %19 = vector.broadcast %cst_8 : f32 to vector<2x128xf32>
    %20 = arith.select %6, %18, %19 : vector<2x128xi1>, vector<2x128xf32>
    %cst_9 = arith.constant dense<0xFF800000> : vector<2xf32>
    %21 = vector.multi_reduction <maximumf>, %20, %cst_9 [1] : vector<2x128xf32> to vector<2xf32>
    %22 = vector.shape_cast %21 : vector<2xf32> to vector<2x1xf32>
    %23 = vector.broadcast %22 : vector<2x1xf32> to vector<2x128xf32>
    %24 = arith.mulf %23, %8 : vector<2x128xf32>
    %cst_10 = arith.constant dense<0.000000e+00> : vector<128xf32>
    %25 = vector.multi_reduction <add>, %24, %cst_10 [0] : vector<2x128xf32> to vector<128xf32>
    %26 = vector.shape_cast %25 : vector<128xf32> to vector<1x128xf32>
    %c0_i32 = arith.constant 0 : i32
    %27 = vector.broadcast %c0_i32 : i32 to vector<4x128xi32>
    %28 = arith.cmpi eq, %14, %27 : vector<4x128xi32>
    %29 = vector.shape_cast %26 : vector<1x128xf32> to vector<1x128xf32>
    %30 = vector.broadcast %29 : vector<1x128xf32> to vector<4x128xf32>
    %31 = arith.select %28, %30, %15 : vector<4x128xi1>, vector<4x128xf32>
    %32 = vector.extract_strided_slice %13 {offsets = [1, 0], sizes = [1, 128], strides = [1, 1]} : vector<4x128xf32> to vector<1x128xf32>
    %cst_11 = arith.constant -1.000000e+30 : f32
    %33 = vector.shape_cast %32 : vector<1x128xf32> to vector<1x128xf32>
    %34 = vector.broadcast %33 : vector<1x128xf32> to vector<2x128xf32>
    %35 = vector.broadcast %cst_11 : f32 to vector<2x128xf32>
    %36 = arith.select %6, %34, %35 : vector<2x128xi1>, vector<2x128xf32>
    %cst_12 = arith.constant dense<0xFF800000> : vector<2xf32>
    %37 = vector.multi_reduction <maximumf>, %36, %cst_12 [1] : vector<2x128xf32> to vector<2xf32>
    %38 = vector.shape_cast %37 : vector<2xf32> to vector<2x1xf32>
    %39 = vector.broadcast %38 : vector<2x1xf32> to vector<2x128xf32>
    %40 = arith.mulf %39, %8 : vector<2x128xf32>
    %cst_13 = arith.constant dense<0.000000e+00> : vector<128xf32>
    %41 = vector.multi_reduction <add>, %40, %cst_13 [0] : vector<2x128xf32> to vector<128xf32>
    %42 = vector.shape_cast %41 : vector<128xf32> to vector<1x128xf32>
    %c1_i32 = arith.constant 1 : i32
    %43 = vector.broadcast %c1_i32 : i32 to vector<4x128xi32>
    %44 = arith.cmpi eq, %14, %43 : vector<4x128xi32>
    %45 = vector.shape_cast %42 : vector<1x128xf32> to vector<1x128xf32>
    %46 = vector.broadcast %45 : vector<1x128xf32> to vector<4x128xf32>
    %47 = arith.select %44, %46, %31 : vector<4x128xi1>, vector<4x128xf32>
    %48 = vector.extract_strided_slice %13 {offsets = [2, 0], sizes = [1, 128], strides = [1, 1]} : vector<4x128xf32> to vector<1x128xf32>
    %cst_14 = arith.constant -1.000000e+30 : f32
    %49 = vector.shape_cast %48 : vector<1x128xf32> to vector<1x128xf32>
    %50 = vector.broadcast %49 : vector<1x128xf32> to vector<2x128xf32>
    %51 = vector.broadcast %cst_14 : f32 to vector<2x128xf32>
    %52 = arith.select %6, %50, %51 : vector<2x128xi1>, vector<2x128xf32>
    %cst_15 = arith.constant dense<0xFF800000> : vector<2xf32>
    %53 = vector.multi_reduction <maximumf>, %52, %cst_15 [1] : vector<2x128xf32> to vector<2xf32>
    %54 = vector.shape_cast %53 : vector<2xf32> to vector<2x1xf32>
    %55 = vector.broadcast %54 : vector<2x1xf32> to vector<2x128xf32>
    %56 = arith.mulf %55, %8 : vector<2x128xf32>
    %cst_16 = arith.constant dense<0.000000e+00> : vector<128xf32>
    %57 = vector.multi_reduction <add>, %56, %cst_16 [0] : vector<2x128xf32> to vector<128xf32>
    %58 = vector.shape_cast %57 : vector<128xf32> to vector<1x128xf32>
    %c2_i32_17 = arith.constant 2 : i32
    %59 = vector.broadcast %c2_i32_17 : i32 to vector<4x128xi32>
    %60 = arith.cmpi eq, %14, %59 : vector<4x128xi32>
    %61 = vector.shape_cast %58 : vector<1x128xf32> to vector<1x128xf32>
    %62 = vector.broadcast %61 : vector<1x128xf32> to vector<4x128xf32>
    %63 = arith.select %60, %62, %47 : vector<4x128xi1>, vector<4x128xf32>
    %64 = vector.extract_strided_slice %13 {offsets = [3, 0], sizes = [1, 128], strides = [1, 1]} : vector<4x128xf32> to vector<1x128xf32>
    %cst_18 = arith.constant -1.000000e+30 : f32
    %65 = vector.shape_cast %64 : vector<1x128xf32> to vector<1x128xf32>
    %66 = vector.broadcast %65 : vector<1x128xf32> to vector<2x128xf32>
    %67 = vector.broadcast %cst_18 : f32 to vector<2x128xf32>
    %68 = arith.select %6, %66, %67 : vector<2x128xi1>, vector<2x128xf32>
    %cst_19 = arith.constant dense<0xFF800000> : vector<2xf32>
    %69 = vector.multi_reduction <maximumf>, %68, %cst_19 [1] : vector<2x128xf32> to vector<2xf32>
    %70 = vector.shape_cast %69 : vector<2xf32> to vector<2x1xf32>
    %71 = vector.broadcast %70 : vector<2x1xf32> to vector<2x128xf32>
    %72 = arith.mulf %71, %8 : vector<2x128xf32>
    %cst_20 = arith.constant dense<0.000000e+00> : vector<128xf32>
    %73 = vector.multi_reduction <add>, %72, %cst_20 [0] : vector<2x128xf32> to vector<128xf32>
    %74 = vector.shape_cast %73 : vector<128xf32> to vector<1x128xf32>
    %c3_i32 = arith.constant 3 : i32
    %75 = vector.broadcast %c3_i32 : i32 to vector<4x128xi32>
    %76 = arith.cmpi eq, %14, %75 : vector<4x128xi32>
    %77 = vector.shape_cast %74 : vector<1x128xf32> to vector<1x128xf32>
    %78 = vector.broadcast %77 : vector<1x128xf32> to vector<4x128xf32>
    %79 = arith.select %76, %78, %63 : vector<4x128xi1>, vector<4x128xf32>
    %80 = arith.subf %13, %79 : vector<4x128xf32>
    %cst_21 = arith.constant 0.000000e+00 : f32
    %81 = vector.broadcast %cst_21 : f32 to vector<4x128xf32>
    %82 = arith.minimumf %80, %81 : vector<4x128xf32>
    %83 = math.exp %82 : vector<4x128xf32>
    %cst_22 = arith.constant 0.000000e+00 : f32
    %84 = vector.shape_cast %3 : vector<1x128xi1> to vector<1x128xi1>
    %85 = vector.broadcast %84 : vector<1x128xi1> to vector<4x128xi1>
    %86 = vector.broadcast %cst_22 : f32 to vector<4x128xf32>
    %87 = arith.select %85, %83, %86 : vector<4x128xi1>, vector<4x128xf32>
    %cst_23 = arith.constant dense<0.000000e+00> : vector<4x2xf32>
    %88 = tpu.matmul %87, %8, %cst_23 {dimension_numbers = #tpu.dot_dimension_numbers<[1], [1], [0], [0], [0, 0, 1, 0], [], []>} : vector<4x128xf32>, vector<2x128xf32>, vector<4x2xf32> -> vector<4x2xf32>
    %cst_24 = arith.constant dense<0.000000e+00> : vector<4x128xf32>
    %89 = tpu.matmul %88, %8, %cst_24 {dimension_numbers = #tpu.dot_dimension_numbers<[1], [0], [0], [1], [0, 0, 1, 1], [], []>} : vector<4x2xf32>, vector<2x128xf32>, vector<4x128xf32> -> vector<4x128xf32>
    %cst_25 = arith.constant 9.99999971E-10 : f32
    %90 = vector.broadcast %cst_25 : f32 to vector<4x128xf32>
    %91 = arith.addf %89, %90 : vector<4x128xf32>
    %92 = arith.divf %87, %91 : vector<4x128xf32>
    %93 = vector.extract_strided_slice %92 {offsets = [0, 0], sizes = [1, 128], strides = [1, 1]} : vector<4x128xf32> to vector<1x128xf32>
    %94 = vector.broadcast %93 : vector<1x128xf32> to vector<2x128xf32>
    %95 = arith.mulf %8, %94 : vector<2x128xf32>
    %cst_26 = arith.constant dense<0.000000e+00> : vector<2x32xf32>
    %96 = tpu.matmul %95, %0, %cst_26 {dimension_numbers = #tpu.dot_dimension_numbers<[1], [0], [0], [1], [0, 0, 1, 1], [], []>} : vector<2x128xf32>, vector<128x32xf32>, vector<2x32xf32> -> vector<2x32xf32>
    %c0_27 = arith.constant 0 : index
    %c0_28 = arith.constant 0 : index
    %97 = vector.load %arg4[%c0_27, %c0_28] : memref<2x128xf32, #tpu.memory_space<vmem>>, vector<2x32xf32>
    tpu.vector_store %arg4[%c0_27, %c0_28], %96 {strides = array<i32>} : memref<2x128xf32, #tpu.memory_space<vmem>>, vector<2x32xf32>,
    %98 = vector.extract_strided_slice %92 {offsets = [1, 0], sizes = [1, 128], strides = [1, 1]} : vector<4x128xf32> to vector<1x128xf32>
    %99 = vector.broadcast %98 : vector<1x128xf32> to vector<2x128xf32>
    %100 = arith.mulf %8, %99 : vector<2x128xf32>
    %cst_29 = arith.constant dense<0.000000e+00> : vector<2x32xf32>
    %101 = tpu.matmul %100, %0, %cst_29 {dimension_numbers = #tpu.dot_dimension_numbers<[1], [0], [0], [1], [0, 0, 1, 1], [], []>} : vector<2x128xf32>, vector<128x32xf32>, vector<2x32xf32> -> vector<2x32xf32>
    %c0_30 = arith.constant 0 : index
    %c32 = arith.constant 32 : index
    %102 = vector.load %arg4[%c0_30, %c32] : memref<2x128xf32, #tpu.memory_space<vmem>>, vector<2x32xf32>
    tpu.vector_store %arg4[%c0_30, %c32], %101 {strides = array<i32>} : memref<2x128xf32, #tpu.memory_space<vmem>>, vector<2x32xf32>,
    %103 = vector.extract_strided_slice %92 {offsets = [2, 0], sizes = [1, 128], strides = [1, 1]} : vector<4x128xf32> to vector<1x128xf32>
    %104 = vector.broadcast %103 : vector<1x128xf32> to vector<2x128xf32>
    %105 = arith.mulf %8, %104 : vector<2x128xf32>
    %cst_31 = arith.constant dense<0.000000e+00> : vector<2x32xf32>
    %106 = tpu.matmul %105, %0, %cst_31 {dimension_numbers = #tpu.dot_dimension_numbers<[1], [0], [0], [1], [0, 0, 1, 1], [], []>} : vector<2x128xf32>, vector<128x32xf32>, vector<2x32xf32> -> vector<2x32xf32>
    %c0_32 = arith.constant 0 : index
    %c64 = arith.constant 64 : index
    %107 = vector.load %arg4[%c0_32, %c64] : memref<2x128xf32, #tpu.memory_space<vmem>>, vector<2x32xf32>
    tpu.vector_store %arg4[%c0_32, %c64], %106 {strides = array<i32>} : memref<2x128xf32, #tpu.memory_space<vmem>>, vector<2x32xf32>,
    %108 = vector.extract_strided_slice %92 {offsets = [3, 0], sizes = [1, 128], strides = [1, 1]} : vector<4x128xf32> to vector<1x128xf32>
    %109 = vector.broadcast %108 : vector<1x128xf32> to vector<2x128xf32>
    %110 = arith.mulf %8, %109 : vector<2x128xf32>
    %cst_33 = arith.constant dense<0.000000e+00> : vector<2x32xf32>
    %111 = tpu.matmul %110, %0, %cst_33 {dimension_numbers = #tpu.dot_dimension_numbers<[1], [0], [0], [1], [0, 0, 1, 1], [], []>} : vector<2x128xf32>, vector<128x32xf32>, vector<2x32xf32> -> vector<2x32xf32>
    %c0_34 = arith.constant 0 : index
    %c96 = arith.constant 96 : index
    %112 = vector.load %arg4[%c0_34, %c96] : memref<2x128xf32, #tpu.memory_space<vmem>>, vector<2x32xf32>
    tpu.vector_store %arg4[%c0_34, %c96], %111 {strides = array<i32>} : memref<2x128xf32, #tpu.memory_space<vmem>>, vector<2x32xf32>,
    return
  }
}

</mosaic_0001>

<bundles_post_ra>
// kernel: tpu_custom_call.1
= control target key start
LH: loop header
LB: loop body
LE: loop exit
PB: predicated region body
PF: predicated region fallthrough
CT: control target
= control target key end

     0   :  { %vm52_vm0 = vcmask 261120   ;;  %v1203_v2 = vmov 0.0|0.0   ;;  %v1204_v5 = vmov 0.0   ;;  %vm1205_vm2 = vmmov 0   ;;  %s1525_s0 = inlined_call_operand.vmem [shape: s32[1,128], index: 0, kind: input, shape index: {}]   ;;  %s1526_s1 = inlined_call_operand.vmem [shape: f32[128,32], index: 1, kind: input, shape index: {}]   ;;  %s1527_s2 = inlined_call_operand.vmem [shape: f32[4,32], index: 2, kind: input, shape index: {}]   ;;  %s1528_s3 = inlined_call_operand.vmem [shape: f32[4,1], index: 3, kind: input, shape index: {}]   ;;  %s1529_s4 = inlined_call_operand.hbm [shape: f32[2,128], index: 4, kind: output, shape index: {}]  }
   0x1   :  { %v18_v0 = vld [vmem:[%s1526_s1] sm:$0xff]  ;;  %v19_v1 = vld [vmem:[%s1526_s1 + $0x8] sm:$0xff]  ;;  %1037 = vmatprep.subr.bf16.mxu0 %v1203_v2  ;;  %vm1248_vm1 = vmpackc.low %vm52_vm0, %vm52_vm0  ;;  %892 = vmatprep.subr.mxu1 %v1204_v5  ;;  %v1206_v6 = vmov 0  }
   0x2   :  { %v1244_v3 = vpack.c.bf16 %v19_v1, %v18_v0  ;;  %884 = vmatprep.mubr.msk.f32.mxu0 %vm1205_vm2, %v1204_v5  ;;  %1174 = vset.pattern.permute.xlu0 %v1206_v6  ;;  %v20_v7 = vld [vmem:[%s1526_s1 + $0x10] sm:$0xff]  ;;  %v21_v8 = vld [vmem:[%s1526_s1 + $0x18] sm:$0xff]  ;;  %v34_v9 = vld [vmem:[%s1525_s0] sm:$0x1] }
   0x3   :  { %894 = vmatprep.mubr.msk.f32.mxu1 %vm1205_vm2, %v1204_v5  ;;  %v46_v10 = vld [vmem:[%s1528_s3] sm:$0xf] }
   0x4   :  { %1040 = vmatpush3.bf16.xpose.msk.msra.mxu0 %vm1248_vm1, %v1244_v3 }
   0x5   :  { %1041 = vmatprep.subr.bf16.mxu0 %v1203_v2 }
   0x6   :  { %9 = vsyncpa [#allocation3], 0  ;;  %v1273_v11 = vpack.c.bf16 %v21_v8, %v20_v7  ;;  %vm35_vm3 = vcmp.lt.s32.totalorder %v34_v9, 2  ;;  %49 = vperm.xlu0 %1174, %v46_v10   ;;  %v22_v13 = vld [vmem:[%s1526_s1 + $0x20] sm:$0xff]  ;;  %v23_v14 = vld [vmem:[%s1526_s1 + $0x28] sm:$0xff]  ;;  %v36_v32 = vlaneseq  ;;  %vm179_vm5 = vcmask 1041408  }
   0x7   :  { %v1275_v12 = vsel %vm35_vm3, 1, %v1206_v6  ;;  %v1287_v15 = vpack.c.bf16 %v23_v14, %v22_v13  ;;  %v24_v16 = vld [vmem:[%s1526_s1 + $0x30] sm:$0xff]  ;;  %v25_v17 = vld [vmem:[%s1526_s1 + $0x38] sm:$0xff]  ;;  %v26_v19 = vld [vmem:[%s1526_s1 + $0x40] sm:$0xff]  ;;  %v1207_v57 = vmov 1.0   ;;  %vm328_vm11 = vcmask 15360  }
   0x8   :  { %v1299_v18 = vpack.c.bf16 %v25_v17, %v24_v16  ;;  %v27_v20 = vld [vmem:[%s1526_s1 + $0x48] sm:$0xff]  ;;  %v28_v22 = vld [vmem:[%s1526_s1 + $0x50] sm:$0xff]  ;;  %v29_v23 = vld [vmem:[%s1526_s1 + $0x58] sm:$0xff]  ;;  %v1359_v33 = vshrl.u32 %v36_v32, 7  ;;  %vm482_vm12 = vcmask 254976   ;;  %s1210_s25 = smov 96  }
   0x9   :  { %v1311_v21 = vpack.c.bf16 %v27_v20, %v26_v19  ;;  %v1323_v24 = vpack.c.bf16 %v29_v23, %v28_v22  ;;  %v30_v25 = vld [vmem:[%s1526_s1 + $0x60] sm:$0xff]  ;;  %v31_v26 = vld [vmem:[%s1526_s1 + $0x68] sm:$0xff]  ;;  %v32_v28 = vld [vmem:[%s1526_s1 + $0x70] sm:$0xff]  ;;  %vm563_vm13 = vcmask 517376   ;;  %vm644_vm14 = vcmask 779776   ;;  %s1211_s26 = smov [#allocation2]  }
   0xa   :  { %v1335_v27 = vpack.c.bf16 %v31_v26, %v30_v25  ;;  %v33_v29 = vld [vmem:[%s1526_s1 + $0x78] sm:$0xff]  ;;  %v45_v31 = vld [vmem:[%s1527_s2] sm:$0xf]  ;;  %v1362_v34 = vsub.s32 0, %v1359_v33  ;;  %v195_v39 = vsub.s32 1, %v1359_v33  ;;  %v213_v40 = vsub.s32 2, %v1359_v33 }
   0xb   :  { %v1347_v30 = vpack.c.bf16 %v33_v29, %v32_v28  ;;  %v231_v47 = vsub.s32 3, %v1359_v33  ;;  %vm191_vm6 = vcmp.eq.s32.totalorder %v1359_v33, 0  ;;  %vm209_vm7 = vcmp.eq.s32.totalorder %v1359_v33, 1  ;;  %s1208_s1 = smov 64   ;;  %s1209_s2 = smov 32  }
   0xc   :  { %1044 = vmatpush3.bf16.xpose.msk.msra.mxu0 %vm1248_vm1, %v1273_v11  ;;  %v41_v35 = vrot.slane %v34_v9, %v1362_v34  ;;  %vm227_vm8 = vcmp.eq.s32.totalorder %v1359_v33, 2  ;;  %vm245_vm9 = vcmp.eq.s32.totalorder %v1359_v33, 3  ;;  %s733_s27 = sshll.u32 %s1211_s26, 4  ;;  %vm725_vm15 = vcmask 1042176   ;;  %s734_s27 = int_to_ptr.vmem [resolvable:$true] %s733_s27 }
   0xd   :  { %1045 = vmatprep.subr.bf16.mxu0 %v1203_v2  ;;  %s1179_s28 = scalar_lea.vmem %s734_s27, 32  ;;  %p1184_p1 = scmp.lt.s32.totalorder %s734_s27, %s734_s27 }
   0xe   :  { %vm1366_vm4 = vcmp.eq.s32.totalorder %v1359_v33, %v41_v35  ;;  %p1180_p0 = scmp.ne.s32.totalorder %s734_s27, %s1179_s28  ;;  %p1185_p2 = scmp.lt.s32.totalorder %s1179_s28, %s1179_s28 }
   0xf   :  { %v1373_v37 = vsel %vm1366_vm4, 1.0, %v1204_v5 }
  0x10   :  { %893 = vmatpush3.msk.msra.mxu1 %vm179_vm5, %v1373_v37  ;;  %p1186_p3 = por %p1185_p2, %p1184_p1 }
  0x11   :  { %1069 = vmatprep.subr.bf16.mxu1 %v1203_v2 }
  0x12   :  { %p1187_p4 = pnand %p1186_p3, %p1180_p0 }
  0x14   :  { %1048 = vmatpush3.bf16.xpose.msk.msra.mxu0 %vm1248_vm1, %v1287_v15 }
  0x15   :  { %1049 = vmatprep.subr.bf16.mxu0 %v1203_v2 }
  0x1c   :  { %1052 = vmatpush3.bf16.xpose.msk.msra.mxu0 %vm1248_vm1, %v1299_v18 }
  0x1d   :  { %1053 = vmatprep.subr.bf16.mxu0 %v1203_v2 }
  0x24   :  { %1056 = vmatpush3.bf16.xpose.msk.msra.mxu0 %vm1248_vm1, %v1311_v21 }
  0x25   :  { %1057 = vmatprep.subr.bf16.mxu0 %v1203_v2 }
  0x2c   :  { %1060 = vmatpush3.bf16.xpose.msk.msra.mxu0 %vm1248_vm1, %v1323_v24 }
  0x2d   :  { %1061 = vmatprep.subr.bf16.mxu0 %v1203_v2 }
  0x34   :  { %1064 = vmatpush3.bf16.xpose.msk.msra.mxu0 %vm1248_vm1, %v1335_v27 }
  0x35   :  { %1065 = vmatprep.subr.bf16.mxu0 %v1203_v2 }
  0x3c   :  { %1068 = vmatpush3.bf16.xpose.msk.msra.mxu0 %vm1248_vm1, %v1347_v30 }
  0x3d   :  { %887 = vmatprep.subr.mxu0 %v1204_v5 }
  0x43   :  { %885 = vmatmul.mubr.msk.f32.vlgmr.msra.gmra.mrb[0].mxu0 %vm52_vm0, %v45_v31 }
  0x44   :  { %889 = vmatprep.mubr.msk.f32.mxu0 %vm1205_vm2, %v1204_v5  ;;  %888 = vmatpush3.xpose.msk.msra.mxu0 %vm1366_vm4, %v1207_v57 }
  0x45   :  { %1117 = vmatprep.subr.bf16.mxu0 %v1203_v2 }
  0x85   :  { %v50_v38 = vpop.permute.xlu0 %49 }
 0x116   :  { %v170_v41 = vpop.f32.mrb[0].mxu0 }
 0x117   :  { %v1380_v42 = vadd.f32 %v170_v41, %v50_v38  ;;  %v886_v43 = vpop.f32.mrb[1].mxu0 }
 0x119   :  { %v196_v44 = vrot.slane %v1380_v42, %v195_v39  ;;  %v177_v45 = vrot.slane %v1380_v42, %v1362_v34  ;;  %v214_v46 = vrot.slane %v1380_v42, %v213_v40  ;;  %v232_v53 = vrot.slane %v1380_v42, %v231_v47 }
 0x11b   :  { %v197_v48 = vsel %vm1366_vm4, %v196_v44, -1e+30  ;;  %v178_v49 = vsel %vm1366_vm4, %v177_v45, -1e+30  ;;  %v215_v52 = vsel %vm1366_vm4, %v214_v46, -1e+30 }
 0x11c   :  { %v198_v50 = vsel %vm179_vm5, %v197_v48, -inf  ;;  %v180_v51 = vsel %vm179_vm5, %v178_v49, -inf  ;;  %v216_v54 = vsel %vm179_vm5, %v215_v52, -inf  ;;  %v233_v55 = vsel %vm1366_vm4, %v232_v53, -1e+30 }
 0x11d   :  { %199 = vmax.xlane.f32.xlu1 %v198_v50  ;;  %181 = vmax.xlane.f32.xlu0 %v180_v51  ;;  %v234_v56 = vsel %vm179_vm5, %v233_v55, -inf  ;;  %v255_v55 = vrot.slane %v1275_v12, %v1362_v34 }
 0x11f   :  { %vm1424_vm10 = vcmp.eq.s32.totalorder %v255_v55, 1 }
 0x121   :  { %217 = vmax.xlane.f32.xlu1 %v216_v54 }
 0x125   :  { %235 = vmax.xlane.f32.xlu1 %v234_v56 }
 0x1aa   :  { %v200_v58 = vpop.xlane.xlu1 %199  ;;  %v182_v59 = vpop.xlane.xlu0 %181 }
 0x1ab   :  { %v201_v60 = vmul.f32 %v1373_v37, %v200_v58  ;;  %v183_v61 = vmul.f32 %v1373_v37, %v182_v59 }
 0x1ad   :  { %v202_v62 = vsel %vm179_vm5, %v201_v60, 0.0  ;;  %v184_v63 = vsel %vm179_vm5, %v183_v61, 0.0 }
 0x1ae   :  { %v203_v0 = vrot.slane %v202_v62, 4  ;;  %v185_v1 = vrot.slane %v184_v63, 4  ;;  %v218_v4 = vpop.xlane.xlu1 %217 }
 0x1af   :  { %v219_v6 = vmul.f32 %v1373_v37, %v218_v4 }
 0x1b0   :  { %v204_v7 = vadd.f32 %v203_v0, %v202_v62  ;;  %v186_v8 = vadd.f32 %v185_v1, %v184_v63 }
 0x1b1   :  { %v220_v9 = vsel %vm179_vm5, %v219_v6, 0.0 }
 0x1b2   :  { %v205_v10 = vrot.slane %v204_v7, 2  ;;  %v187_v13 = vrot.slane %v186_v8, 2  ;;  %v221_v14 = vrot.slane %v220_v9, 4  ;;  %v236_v16 = vpop.xlane.xlu1 %235 }
 0x1b3   :  { %v237_v17 = vmul.f32 %v1373_v37, %v236_v16 }
 0x1b4   :  { %v206_v19 = vadd.f32 %v205_v10, %v204_v7  ;;  %v188_v20 = vadd.f32 %v187_v13, %v186_v8  ;;  %v222_v22 = vadd.f32 %v221_v14, %v220_v9 }
 0x1b5   :  { %v238_v23 = vsel %vm179_vm5, %v237_v17, 0.0 }
 0x1b6   :  { %v189_v25 = vrot.slane %v188_v20, 1  ;;  %v223_v26 = vrot.slane %v222_v22, 2  ;;  %v239_v28 = vrot.slane %v238_v23, 4  ;;  %v207_v29 = vrot.slane %v206_v19, 1 }
 0x1b8   :  { %v224_v31 = vadd.f32 %v223_v26, %v222_v22  ;;  %v240_v32 = vadd.f32 %v239_v28, %v238_v23  ;;  %v190_v35 = vadd.f32 %v189_v25, %v188_v20  ;;  %v208_v41 = vadd.f32 %v207_v29, %v206_v19 }
 0x1ba   :  { %v225_v36 = vrot.slane %v224_v31, 1  ;;  %v241_v38 = vrot.slane %v240_v32, 2  ;;  %v192_v44 = vsel %vm191_vm6, %v190_v35, 0.0 }
 0x1bb   :  { %v210_v48 = vsel %vm209_vm7, %v208_v41, %v192_v44 }
 0x1bc   :  { %v242_v43 = vadd.f32 %v241_v38, %v240_v32  ;;  %v226_v45 = vadd.f32 %v225_v36, %v224_v31 }
 0x1be   :  { %v243_v46 = vrot.slane %v242_v43, 1  ;;  %v228_v50 = vsel %vm227_vm8, %v226_v45, %v210_v48 }
 0x1c0   :  { %v244_v49 = vadd.f32 %v243_v46, %v242_v43 }
 0x1c2   :  { %v246_v51 = vsel %vm245_vm9, %v244_v49, %v228_v50 }
 0x1c3   :  { %v247_v52 = vsub.f32 %v1380_v42, %v246_v51 }
 0x1c5   :  { %v248_v53 = vmin.f32 %v247_v52, 0.0 }
 0x1c7   :  { %v249_v54 = vmul.f32 1.442695, %v248_v53 }
 0x1c9   :  { %1175 = vpow2.f32 %v249_v54 }
 0x1d3   :  { %v1176_v57 = vpop.eup %1175 }
 0x1d4   :  { %890 = vmatmul.mubr.msk.f32.vlgmr.msra.gmra.mrb[2].mxu0 %vm1424_vm10, %v1176_v57  ;;  %v257_v58 = vsel %vm1424_vm10, %v1176_v57, 0.0 }
 0x1d5   :  { %1119 = vmatpush3.bf16.msra.mxu0 %v1244_v3  ;;  %999 = vmatprep.mubr.msk.f32.mxu0 %vm1205_vm2, %v1204_v5 }
 0x1d6   :  { %1120 = vmatprep.subr.bf16.mxu0 %v1203_v2 }
 0x1d9   :  { %1122 = vmatpush3.bf16.msra.mxu0 %v1273_v11 }
 0x1da   :  { %1123 = vmatprep.subr.bf16.mxu0 %v1203_v2 }
 0x1dd   :  { %1125 = vmatpush3.bf16.msra.mxu0 %v1287_v15 }
 0x1de   :  { %1126 = vmatprep.subr.bf16.mxu0 %v1203_v2 }
 0x1e1   :  { %1128 = vmatpush3.bf16.msra.mxu0 %v1299_v18 }
 0x1e2   :  { %1129 = vmatprep.subr.bf16.mxu0 %v1203_v2 }
 0x1e5   :  { %1131 = vmatpush3.bf16.msra.mxu0 %v1311_v21 }
 0x1e6   :  { %1132 = vmatprep.subr.bf16.mxu0 %v1203_v2 }
 0x1e9   :  { %1134 = vmatpush3.bf16.msra.mxu0 %v1323_v24 }
 0x1ea   :  { %1135 = vmatprep.subr.bf16.mxu0 %v1203_v2 }
 0x1ed   :  { %1137 = vmatpush3.bf16.msra.mxu0 %v1335_v27 }
 0x1ee   :  { %1138 = vmatprep.subr.bf16.mxu0 %v1203_v2 }
 0x1f1   :  { %1140 = vmatpush3.bf16.msra.mxu0 %v1347_v30 }
 0x2a7   :  { %v324_v12 = vpop.f32.mrb[2].mxu0 }
 0x2a8   :  { %v891_v42 = vpop.f32.mrb[3].mxu0  ;;  %895 = vmatmul.mubr.msk.f32.vlgmr.msra.gmra.mrb[0].mxu1 %vm328_vm11, %v324_v12 }
 0x2a9   :  { %1071 = vmatpush3.bf16.msra.mxu1 %v1244_v3  ;;  %929 = vmatprep.mubr.msk.f32.mxu1 %vm1205_vm2, %v1204_v5 }
 0x2aa   :  { %1072 = vmatprep.subr.bf16.mxu1 %v1203_v2 }
 0x2ad   :  { %1074 = vmatpush3.bf16.msra.mxu1 %v1273_v11 }
 0x2ae   :  { %1075 = vmatprep.subr.bf16.mxu1 %v1203_v2 }
 0x2b1   :  { %1077 = vmatpush3.bf16.msra.mxu1 %v1287_v15 }
 0x2b2   :  { %1078 = vmatprep.subr.bf16.mxu1 %v1203_v2 }
 0x2b5   :  { %1080 = vmatpush3.bf16.msra.mxu1 %v1299_v18 }
 0x2b6   :  { %1081 = vmatprep.subr.bf16.mxu1 %v1203_v2 }
 0x2b9   :  { %1083 = vmatpush3.bf16.msra.mxu1 %v1311_v21 }
 0x2ba   :  { %1084 = vmatprep.subr.bf16.mxu1 %v1203_v2 }
 0x2bd   :  { %1086 = vmatpush3.bf16.msra.mxu1 %v1323_v24 }
 0x2be   :  { %1087 = vmatprep.subr.bf16.mxu1 %v1203_v2 }
 0x2c1   :  { %1089 = vmatpush3.bf16.msra.mxu1 %v1335_v27 }
 0x2c2   :  { %1090 = vmatprep.subr.bf16.mxu1 %v1203_v2 }
 0x2c5   :  { %1092 = vmatpush3.bf16.msra.mxu1 %v1347_v30 }
 0x2c6   :  { %1093 = vmatprep.subr.bf16.mxu1 %v1203_v2 }
 0x37b   :  { %v401_v59 = vpop.f32.mrb[0].mxu1 }
 0x37c   :  { %v402_v60 = vadd.f32 1e-09, %v401_v59  ;;  %v896_v61 = vpop.f32.mrb[1].mxu1 }
 0x37e   :  { %1177 = vrcp.f32 %v402_v60 }
 0x388   :  { %v1178_v62 = vpop.eup %1177 }
 0x389   :  { %v406_v63 = vmul.f32 %v1178_v62, %v257_v58 }
 0x38b   :  { %v410_v0 = vrot.slane %v406_v63, %v1362_v34  ;;  %v568_v1 = vrot.slane %v406_v63, %v213_v40  ;;  %v487_v34 = vrot.slane %v406_v63, %v195_v39 }
 0x38d   :  { %v411_v4 = vmul.f32 %v1373_v37, %v410_v0  ;;  %v569_v6 = vmul.f32 %v1373_v37, %v568_v1  ;;  %v488_v40 = vmul.f32 %v1373_v37, %v487_v34 }
 0x38f   :  { %930 = vmatmul.mubr.f32.vlgmr.msra.gmra.mrb[2].mxu1 %v411_v4  ;;  %1000 = vmatmul.mubr.f32.vlgmr.msra.gmra.mrb[4].mxu0 %v569_v6 }
 0x390   :  { %1095 = vmatpush3.bf16.msra.mxu1 %v1244_v3  ;;  %964 = vmatprep.mubr.msk.f32.mxu1 %vm1205_vm2, %v1204_v5 }
 0x391   :  { %1096 = vmatprep.subr.bf16.mxu1 %v1203_v2 }
 0x394   :  { %1098 = vmatpush3.bf16.msra.mxu1 %v1273_v11 }
 0x395   :  { %1099 = vmatprep.subr.bf16.mxu1 %v1203_v2 }
 0x398   :  { %1101 = vmatpush3.bf16.msra.mxu1 %v1287_v15 }
 0x399   :  { %1102 = vmatprep.subr.bf16.mxu1 %v1203_v2 }
 0x39c   :  { %1104 = vmatpush3.bf16.msra.mxu1 %v1299_v18 }
 0x39d   :  { %1105 = vmatprep.subr.bf16.mxu1 %v1203_v2 }
 0x3a0   :  { %1107 = vmatpush3.bf16.msra.mxu1 %v1311_v21 }
 0x3a1   :  { %1108 = vmatprep.subr.bf16.mxu1 %v1203_v2 }
 0x3a4   :  { %1110 = vmatpush3.bf16.msra.mxu1 %v1323_v24 }
 0x3a5   :  { %1111 = vmatprep.subr.bf16.mxu1 %v1203_v2 }
 0x3a8   :  { %1113 = vmatpush3.bf16.msra.mxu1 %v1335_v27 }
 0x3a9   :  { %1114 = vmatprep.subr.bf16.mxu1 %v1203_v2 }
 0x3ac   :  { %1116 = vmatpush3.bf16.msra.mxu1 %v1347_v30 }
 0x3ad   :  { %1141 = vmatprep.subr.bf16.mxu1 %v1203_v2 }
 0x3af   :  { %965 = vmatmul.mubr.f32.vlgmr.msra.gmra.mrb[4].mxu1 %v488_v40 }
 0x3b0   :  { %1143 = vmatpush3.bf16.msra.mxu1 %v1244_v3  ;;  %1034 = vmatprep.mubr.msk.f32.mxu1 %vm1205_vm2, %v1204_v5  ;;  %v649_v3 = vrot.slane %v406_v63, %v231_v47 }
 0x3b1   :  { %1144 = vmatprep.subr.bf16.mxu1 %v1203_v2 }
 0x3b2   :  { %v650_v5 = vmul.f32 %v1373_v37, %v649_v3 }
 0x3b4   :  { %1146 = vmatpush3.bf16.msra.mxu1 %v1273_v11 }
 0x3b5   :  { %1147 = vmatprep.subr.bf16.mxu1 %v1203_v2 }
 0x3b8   :  { %1149 = vmatpush3.bf16.msra.mxu1 %v1287_v15 }
 0x3b9   :  { %1150 = vmatprep.subr.bf16.mxu1 %v1203_v2 }
 0x3bc   :  { %1152 = vmatpush3.bf16.msra.mxu1 %v1299_v18 }
 0x3bd   :  { %1153 = vmatprep.subr.bf16.mxu1 %v1203_v2 }
 0x3c0   :  { %1155 = vmatpush3.bf16.msra.mxu1 %v1311_v21 }
 0x3c1   :  { %1156 = vmatprep.subr.bf16.mxu1 %v1203_v2 }
 0x3c4   :  { %1158 = vmatpush3.bf16.msra.mxu1 %v1323_v24 }
 0x3c5   :  { %1159 = vmatprep.subr.bf16.mxu1 %v1203_v2 }
 0x3c8   :  { %1161 = vmatpush3.bf16.msra.mxu1 %v1335_v27 }
 0x3c9   :  { %1162 = vmatprep.subr.bf16.mxu1 %v1203_v2 }
 0x3cc   :  { %1164 = vmatpush3.bf16.msra.mxu1 %v1347_v30 }
 0x3cf   :  { %1035 = vmatmul.mubr.f32.vlgmr.msra.gmra.mrb[6].mxu1 %v650_v5 }
 0x462   :  { %v478_v11 = vpop.f32.mrb[2].mxu1  ;;  %v636_v15 = vpop.f32.mrb[4].mxu0 }
 0x463   :  { %483 = vst.msk [vmem:[#allocation2] sm:$0x3] %vm482_vm12, %v478_v11  ;;  %v931_v18 = vpop.f32.mrb[3].mxu1  ;;  %641 = vrot.lane.b32.xlu1 %v636_v15, %s1208_s1  ;;  %v1001_v21 = vpop.f32.mrb[5].mxu0 }
 0x482   :  { %v555_v24 = vpop.f32.mrb[4].mxu1 }
 0x483   :  { %v966_v27 = vpop.f32.mrb[5].mxu1  ;;  %560 = vrot.lane.b32.xlu1 %v555_v24, %s1209_s2 }
 0x4a2   :  { %v717_v2 = vpop.f32.mrb[6].mxu1 }
 0x4a3   :  { %v1036_v33 = vpop.f32.mrb[7].mxu1  ;;  %722 = vrot.lane.b32.xlu1 %v717_v2, %s1210_s25 }
 0x4d5   :  { %v642_v30 = vpop.permute.xlu1 %641 }
 0x4f5   :  { %v561_v37 = vpop.permute.xlu1 %560 }
 0x4f6   :  { %564 = vst.msk [vmem:[#allocation2] sm:$0x3] %vm563_vm13, %v561_v37 }
 0x4f7   :  { %645 = vst.msk [vmem:[#allocation2] sm:$0x3] %vm644_vm14, %v642_v30 }
 0x515   :  { %v723_v39 = vpop.permute.xlu1 %722 }
 0x516   :  { %726 = vst.msk [vmem:[#allocation2] sm:$0x3] %vm725_vm15, %v723_v39 }
 0x517   :  { %1190 = shalt.err (!%p1187_p4)
}
 0x518   :  { %s1191_s3 = scalar_lea.hbm %s1529_s4, 32 }
 0x519   :  { %p1192_p5 = scmp.ne.s32.totalorder %s1529_s4, %s1191_s3  ;;  %p1195_p6 = scmp.lt.u32.totalorder %s1191_s3, %s1529_s4 }
 0x51b   :  { %p1197_p7 = pnand %p1195_p6, %p1192_p5 }
 0x51d   :  { %1200 = shalt.err (!%p1197_p7)
}
 0x51e   :  { %736 = dma.vmem_to_hbm [thread:$0]  %s734_s27, 32, %s1529_s4, [#allocation3]  }
 0x51f   :  { %1201 = dma.done.wait [#allocation3], 32  }
 0x520   :  { %1202 = vsyncadd [#allocation3], 4294967264 }
 0x521   :  { %740 = vsyncpa [#allocation3], 1 }

</bundles_post_ra>
